<compile_context>
chip_gen: v6e
topology: v6e:2x2x1
jax: 0.10.0
libtpu: 0.0.40
codegen_flags: <defaults>
</compile_context>

<pallas_src>
import functools
import operator

import jax
import jax.numpy as jnp
from jax import lax
from jax.experimental import pallas as pl
from jax.experimental.pallas import tpu as pltpu


def _round_up(x, m):
    return ((x + m - 1) // m) * m


def _vmem_capacity_bytes():
    """Physical VMEM per TensorCore; conservative fallback (v7x) if unknown."""
    try:
        cap = int(pltpu.get_tpu_info().vmem_capacity_bytes)
        if cap > 0:
            return cap
    except Exception:
        pass
    return 64 << 20


def _sle_params_kernel(x_ref, w_ref, b_ref, out_ref, *, out_p1):
    # x_ref:   (TB, insize)      -- batch on sublanes, features on lanes
    # w_ref:   (out_p1, insize)  -- nn.Linear weight, untransposed
    # b_ref:   (out_p1, 1)       -- bias, broadcast over lanes
    # out_ref: (out_p1, TB)      -- lane-dense: batch on lanes
    x = x_ref[...]                       # native dtype straight into the MXU
    w = w_ref[...]
    bias = b_ref[...].astype(jnp.float32)

    # (out_p1, insize) . (TB, insize)^T -> (out_p1, TB): batch lands on lanes,
    # so the writeback is full 128-lane vst's instead of out_p1-wide masked
    # partial stores.  Contracting x on its minor dim may cost an XLU
    # relayout of the x block; with multi-MiB tiles it hides under the DMA.
    # TODO(synk): if a bundle dump shows the relayout exposed, benchmark the
    # x @ w^T formulation with narrow masked stores instead.
    logits = lax.dot_general(
        w, x,
        dimension_numbers=(((1,), (1,)), ((), ())),
        preferred_element_type=jnp.float32,
    ) + bias

    if out_p1 <= 4:
        # Tiny heads: unrolled max/add over row slabs stays on the VPU
        # (no cross-sublane XLU reduce) without blowing the vreg file.
        rows = [logits[r:r + 1, :] for r in range(out_p1)]
        m = functools.reduce(jnp.maximum, rows)
        e = jnp.exp(logits - m)
        denom = functools.reduce(
            operator.add, [e[r:r + 1, :] for r in range(out_p1)])
    else:
        # Larger Dirichlet heads: vectorized sublane reductions keep a single
        # (out_p1, TB) slab live instead of ~2*out_p1 row slabs.
        m = jnp.max(logits, axis=0, keepdims=True)
        e = jnp.exp(logits - m)
        denom = jnp.sum(e, axis=0, keepdims=True)

    # Exact normalization (simplex-exact params) + single full-block store.
    out_ref[...] = (e / denom).astype(out_ref.dtype)


@functools.partial(jax.jit, static_argnames=("block_b", "x_tile_mib"))
def sle_params_net_t(x, weight, bias, *, block_b=None, x_tile_mib=8):
    """Fused Linear(insize, outsize+1) + Softmax(dim=-1).

    x:      (B, insize)            -- f32 or bf16
    weight: (outsize+1, insize)    -- nn.Linear convention (NOT transposed)
    bias:   (outsize+1,)
    returns (outsize+1, B) float32 softmax outputs in lane-dense row layout
    (batch on the minor axis); row r is params[:, r] of the torch output.
    """
    B, insize = x.shape
    out_p1, in_w = weight.shape
    assert in_w == insize, (in_w, insize)
    b2d = bias.reshape(out_p1, 1).astype(jnp.float32)

    isz_x = jnp.dtype(x.dtype).itemsize
    isz_w = jnp.dtype(weight.dtype).itemsize
    insize_pad = _round_up(insize, 128)          # lane padding of the x block
    out_p1_pad = _round_up(out_p1, 8)            # sublane padding of the head

    vmem_cap = _vmem_capacity_bytes()
    # ~48 MiB on v7x (64 MiB/TC), ~96 MiB on v5e/v6e (128 MiB), capped.
    vmem_ceiling = min((vmem_cap * 3) // 4, 100 << 20)
    headroom = 8 << 20

    # ---- batch-tile selection ---------------------------------------------
    if block_b is not None:
        if block_b >= B:
            tb = B
        else:
            tb = max(128, (block_b // 128) * 128)
            if tb >= B:
                tb = B
    elif B <= 128:
        tb = B                                   # single tiny tile
    else:
        # Target ~x_tile_mib MiB of x bytes per step so per-step overhead
        # (~0.35 us) is negligible relative to the DMA.
        tb = (x_tile_mib << 20) // max(insize * isz_x, 1)
        tb = max(128, (tb // 128) * 128)
        # Clamp by the padded, double-buffered VMEM footprint.
        fixed = 2 * (out_p1_pad * insize_pad * isz_w + out_p1_pad * 128 * 4)
        per_row = 2 * (insize_pad * isz_x + out_p1_pad * 4)
        tb_vmem = max((vmem_ceiling - headroom - fixed) // per_row, 128)
        tb = min(tb, max(128, (tb_vmem // 128) * 128))
        # Keep >= 2 grid steps so the "parallel" axis feeds both v7x cores.
        if tb >= B:
            tb = max(128, _round_up(pl.cdiv(B, 2), 128))

    grid = (pl.cdiv(B, tb),)

    # ---- VMEM budget with padded buffer sizes (double-buffered tiles) ------
    tb_sub = _round_up(tb, 8)
    tb_lanes = max(_round_up(tb, 128), 128)
    x_buf = tb_sub * insize_pad * isz_x
    w_buf = out_p1_pad * insize_pad * isz_w
    b_buf = out_p1_pad * 128 * 4
    o_buf = out_p1_pad * tb_lanes * 4
    need = 2 * (x_buf + w_buf + b_buf + o_buf) + (4 << 20)
    vmem_limit = int(min(max(need, 32 << 20), vmem_ceiling))

    cost = pl.CostEstimate(
        flops=2 * B * insize * out_p1 + 4 * B * out_p1,
        transcendentals=B * out_p1,
        bytes_accessed=B * insize * isz_x + out_p1 * insize * isz_w
        + B * out_p1 * 4,
    )

    kernel = functools.partial(_sle_params_kernel, out_p1=out_p1)
    return pl.pallas_call(
        kernel,
        out_shape=jax.ShapeDtypeStruct((out_p1, B), jnp.float32),
        grid_spec=pltpu.PrefetchScalarGridSpec(
            num_scalar_prefetch=0,
            grid=grid,
            in_specs=[
                pl.BlockSpec((tb, insize), lambda i: (i, 0)),
                pl.BlockSpec((out_p1, insize), lambda i: (0, 0)),
                pl.BlockSpec((out_p1, 1), lambda i: (0, 0)),
            ],
            out_specs=pl.BlockSpec((out_p1, tb), lambda i: (0, i)),
        ),
        compiler_params=pltpu.CompilerParams(
            dimension_semantics=("parallel",),
            vmem_limit_bytes=vmem_limit,
        ),
        cost_estimate=cost,
    )(x, weight, b2d)


def sle_layer_forward(x, weight, bias, *, outsize, max_uncertainty=False):
    """Full SLELayer.forward. Returns a dict of distribution parameters."""
    params_t = sle_params_net_t(x, weight, bias)        # (outsize+1, B)

    if outsize in (1, 2):
        # SLBeta(b.flatten(), d.flatten(), uncs.flatten()); widths are <= 1
        # so row-layout flattening matches torch's row-major flatten exactly.
        split = (outsize + 1) // 2                      # tensor_split(2) sizes
        b = params_t[:split].reshape(-1)
        d = params_t[split:outsize].reshape(-1)         # empty when outsize==1
        u = params_t[outsize].reshape(-1)
        dist = {"type": "SLBeta", "b": b, "d": d, "u": u}
    else:
        # SLDirichlet(beliefs, uncs): consumers want (B, outsize) / (B, 1),
        # so transpose only on this branch.
        beliefs = params_t[:outsize].T
        uncs = params_t[outsize:].T
        dist = {"type": "SLDirichlet", "b": beliefs, "u": uncs}

    if max_uncertainty:
        # TODO(synk): SLBeta/SLDirichlet.max_uncertainty() internals are not
        # provided in the reference module; returning raw params unchanged.
        pass
    return dist


if __name__ == "__main__":
    key = jax.random.PRNGKey(0)
    k_x, k_w, k_b = jax.random.split(key, 3)

    batch = 8
    insize = 32
    outsize = 2          # SLBeta branch (outsize in [1, 2])

    x = jax.random.normal(k_x, (batch, insize), dtype=jnp.float32)
    # nn.Linear(insize, outsize+1): weight (outsize+1, insize), bias (outsize+1,)
    weight = jax.random.normal(k_w, (outsize + 1, insize), dtype=jnp.float32) * 0.1
    bias = jax.random.normal(k_b, (outsize + 1,), dtype=jnp.float32) * 0.1

    dist = sle_layer_forward(x, weight, bias, outsize=outsize,
                             max_uncertainty=False)
    jax.block_until_ready((dist["b"], dist["d"], dist["u"]))

    # sanity: b + d + u == 1 exactly on the simplex (exact normalization)
    total = dist["b"] + dist["d"] + dist["u"]
    assert jnp.allclose(total, 1.0, atol=1e-5), total

    # reference check against plain JAX
    ref = jax.nn.softmax(x @ weight.T + bias, axis=-1)
    got_t = sle_params_net_t(x, weight, bias)
    assert jnp.allclose(got_t, ref.T, atol=1e-4), jnp.max(jnp.abs(got_t - ref.T))
    assert jnp.allclose(dist["b"], ref[:, 0], atol=1e-4)
    assert jnp.allclose(dist["d"], ref[:, 1], atol=1e-4)
    assert jnp.allclose(dist["u"], ref[:, 2], atol=1e-4)

    # multi-tile + ragged last batch tile (grid > 1), lane-dense 128-wide stores
    B2 = 300
    x2 = jax.random.normal(k_x, (B2, insize), dtype=jnp.float32)
    got2 = sle_params_net_t(x2, weight, bias, block_b=128)
    ref2 = jax.nn.softmax(x2 @ weight.T + bias, axis=-1)
    assert jnp.allclose(got2, ref2.T, atol=1e-4), jnp.max(jnp.abs(got2 - ref2.T))

    # auto-tiling path: byte-budget tb with >= 2 grid steps when B > 128
    B3 = 1024
    x3 = jax.random.normal(k_w, (B3, insize), dtype=jnp.float32)
    got3 = sle_params_net_t(x3, weight, bias)
    ref3 = jax.nn.softmax(x3 @ weight.T + bias, axis=-1)
    assert jnp.allclose(got3, ref3.T, atol=1e-4), jnp.max(jnp.abs(got3 - ref3.T))

    # Dirichlet branch (outsize > 2) exercises the vectorized softmax path
    out4 = 6
    w4 = jax.random.normal(k_w, (out4 + 1, insize), dtype=jnp.float32) * 0.1
    b4 = jax.random.normal(k_b, (out4 + 1,), dtype=jnp.float32) * 0.1
    dist4 = sle_layer_forward(x, w4, b4, outsize=out4)
    jax.block_until_ready((dist4["b"], dist4["u"]))
    ref4 = jax.nn.softmax(x @ w4.T + b4, axis=-1)
    assert jnp.allclose(dist4["b"], ref4[:, :out4], atol=1e-4)
    assert jnp.allclose(dist4["u"], ref4[:, out4:], atol=1e-4)

    print("KERNEL_OK")
</pallas_src>

<mosaic_0001>
module attributes {stable_mosaic.version = 11 : i64} {
  func.func @_sle_params_kernel(%arg0: i32, %arg1: memref<8x32xf32, #tpu.memory_space<vmem>>, %arg2: memref<3x32xf32, #tpu.memory_space<vmem>>, %arg3: memref<3x1xf32, #tpu.memory_space<vmem>>, %arg4: memref<3x8xf32, #tpu.memory_space<vmem>>) attributes {dimension_semantics = [#tpu.dimension_semantics<parallel>], iteration_bounds = array<i64: 1>, scalar_prefetch = 0 : i64, scratch_operands = 0 : i64, tpu.core_type = #tpu.core_type<tc>, window_params = [{transform_indices = @transform_0, window_bounds = array<i64: 8, 32>}, {pipeline_mode = #tpu.pipeline_mode<synchronous>, transform_indices = @transform_1, window_bounds = array<i64: 3, 32>}, {pipeline_mode = #tpu.pipeline_mode<synchronous>, transform_indices = @transform_2, window_bounds = array<i64: 3, 1>}, {transform_indices = @transform_3, window_bounds = array<i64: 3, 8>}]} {
    %c0 = arith.constant 0 : index
    %c0_0 = arith.constant 0 : index
    %0 = vector.load %arg1[%c0, %c0_0] : memref<8x32xf32, #tpu.memory_space<vmem>>, vector<8x32xf32>
    %c0_1 = arith.constant 0 : index
    %c0_2 = arith.constant 0 : index
    %1 = vector.load %arg2[%c0_1, %c0_2] : memref<3x32xf32, #tpu.memory_space<vmem>>, vector<3x32xf32>
    %c0_3 = arith.constant 0 : index
    %c0_4 = arith.constant 0 : index
    %2 = vector.load %arg3[%c0_3, %c0_4] : memref<3x1xf32, #tpu.memory_space<vmem>>, vector<3x1xf32>
    %cst = arith.constant dense<0.000000e+00> : vector<3x8xf32>
    %3 = tpu.matmul %1, %0, %cst {dimension_numbers = #tpu.dot_dimension_numbers<[1], [1], [0], [0], [0, 0, 1, 0], [], []>} : vector<3x32xf32>, vector<8x32xf32>, vector<3x8xf32> -> vector<3x8xf32>
    %4 = vector.broadcast %2 : vector<3x1xf32> to vector<3x8xf32>
    %5 = arith.addf %3, %4 : vector<3x8xf32>
    %6 = vector.extract_strided_slice %5 {offsets = [0, 0], sizes = [1, 8], strides = [1, 1]} : vector<3x8xf32> to vector<1x8xf32>
    %7 = vector.extract_strided_slice %5 {offsets = [1, 0], sizes = [1, 8], strides = [1, 1]} : vector<3x8xf32> to vector<1x8xf32>
    %8 = vector.extract_strided_slice %5 {offsets = [2, 0], sizes = [1, 8], strides = [1, 1]} : vector<3x8xf32> to vector<1x8xf32>
    %9 = arith.maximumf %6, %7 : vector<1x8xf32>
    %10 = arith.maximumf %9, %8 : vector<1x8xf32>
    %11 = vector.broadcast %10 : vector<1x8xf32> to vector<3x8xf32>
    %12 = arith.subf %5, %11 : vector<3x8xf32>
    %13 = math.exp %12 : vector<3x8xf32>
    %14 = vector.extract_strided_slice %13 {offsets = [0, 0], sizes = [1, 8], strides = [1, 1]} : vector<3x8xf32> to vector<1x8xf32>
    %15 = vector.extract_strided_slice %13 {offsets = [1, 0], sizes = [1, 8], strides = [1, 1]} : vector<3x8xf32> to vector<1x8xf32>
    %16 = vector.extract_strided_slice %13 {offsets = [2, 0], sizes = [1, 8], strides = [1, 1]} : vector<3x8xf32> to vector<1x8xf32>
    %17 = arith.addf %14, %15 : vector<1x8xf32>
    %18 = arith.addf %17, %16 : vector<1x8xf32>
    %19 = vector.broadcast %18 : vector<1x8xf32> to vector<3x8xf32>
    %20 = arith.divf %13, %19 : vector<3x8xf32>
    %c0_5 = arith.constant 0 : index
    %c0_6 = arith.constant 0 : index
    %21 = vector.load %arg4[%c0_5, %c0_6] : memref<3x8xf32, #tpu.memory_space<vmem>>, vector<3x8xf32>
    tpu.vector_store %arg4[%c0_5, %c0_6], %20 {strides = array<i32>} : memref<3x8xf32, #tpu.memory_space<vmem>>, vector<3x8xf32>,
    return
  }
  func.func @transform_0(%arg0: i32) -> (i32, i32) {
    %c0_i32 = arith.constant 0 : i32
    %c0_i32_0 = arith.constant 0 : i32
    return %arg0, %c0_i32 : i32, i32
  }
  func.func @transform_1(%arg0: i32) -> (i32, i32) {
    %c0_i32 = arith.constant 0 : i32
    %c0_i32_0 = arith.constant 0 : i32
    %c0_i32_1 = arith.constant 0 : i32
    return %c0_i32, %c0_i32_0 : i32, i32
  }
  func.func @transform_2(%arg0: i32) -> (i32, i32) {
    %c0_i32 = arith.constant 0 : i32
    %c0_i32_0 = arith.constant 0 : i32
    %c0_i32_1 = arith.constant 0 : i32
    return %c0_i32, %c0_i32_0 : i32, i32
  }
  func.func @transform_3(%arg0: i32) -> (i32, i32) {
    %c0_i32 = arith.constant 0 : i32
    %c0_i32_0 = arith.constant 0 : i32
    return %c0_i32, %arg0 : i32, i32
  }
}

</mosaic_0001>

<bundles_post_ra>
// kernel: sle_params_net_t.1
= control target key start
LH: loop header
LB: loop body
LE: loop exit
PB: predicated region body
PF: predicated region fallthrough
CT: control target
= control target key end

     0   :  { %8 = vsyncpa [#allocation3], 0  ;;  %s256_s0 = inlined_call_operand.hbm [shape: f32[8,32], index: 0, kind: input, shape index: {}]   ;;  %s257_s1 = inlined_call_operand.vmem [shape: f32[3,32], index: 1, kind: input, shape index: {}]   ;;  %s258_s2 = inlined_call_operand.vmem [shape: f32[3,1], index: 2, kind: input, shape index: {}]   ;;  %s259_s3 = inlined_call_operand.hbm [shape: f32[3,8], index: 3, kind: output, shape index: {}]  }
   0x1   :  { %9 = vsyncpa [#allocation4], 0  ;;  %s219_s12 = smov [#allocation2]  }
   0x2   :  { %s16_s13 = sshll.u32 %s219_s12, 4  ;;  %s17_s13 = int_to_ptr.vmem [resolvable:$true] %s16_s13 }
   0x3   :  { %s183_s14 = scalar_lea.vmem %s17_s13, 128  ;;  %p188_p1 = scmp.lt.s32.totalorder %s17_s13, %s17_s13 }
   0x4   :  { %p184_p0 = scmp.ne.s32.totalorder %s17_s13, %s183_s14  ;;  %p189_p2 = scmp.lt.s32.totalorder %s183_s14, %s183_s14 }
   0x6   :  { %p190_p3 = por %p189_p2, %p188_p1 }
   0x8   :  { %p191_p4 = pnand %p190_p3, %p184_p0 }
   0xa   :  { %194 = shalt.err (!%p191_p4)
}
   0xb   :  { %19 = dma.hbm_to_vmem [thread:$0]  %s256_s0, 128, %s17_s13, [#allocation3]  }
   0xc   :  { %215 = dma.done.wait [#allocation3], 128  }
   0xd   :  { %216 = vsyncadd [#allocation3], 4294967168  ;;  %v220_v0 = vmov 0.0   ;;  %vm221_vm0 = vmmov 0   ;;  %v222_v1 = vmov 0   ;;  %vm35_vm1 = vcmask 261120  }
   0xe   :  { %160 = vmatprep.subr.mxu0 %v220_v0  ;;  %162 = vmatprep.mubr.msk.f32.mxu0 %vm221_vm0, %v220_v0  ;;  %v27_v2 = vld [vmem:[#allocation2] sm:$0xff]  ;;  %v119_v5 = vlaneseq  ;;  %s223_s0 = smov [#allocation5]   ;;  %vm139_vm2 = vcmask 59392  }
   0xf   :  { %170 = vset.pattern.permute.xlu0 %v222_v1  ;;  %v29_v3 = vld [vmem:[%s258_s2] sm:$0x7]  ;;  %161 = vmatpush3.xpose.msk.msra.mxu0 %vm35_vm1, %v27_v2 }
  0x10   :  { %v28_v4 = vld [vmem:[%s257_s1] sm:$0x7]  ;;  %32 = vperm.xlu0 %170, %v29_v3   ;;  %v120_v9 = vshrl.u32 %v119_v5, 7  ;;  %s147_s1 = sshll.u32 %s223_s0, 4  ;;  %s148_s1 = int_to_ptr.vmem [resolvable:$true] %s147_s1 }
  0x11   :  { %s195_s2 = scalar_lea.vmem %s148_s1, 64  ;;  %p200_p6 = scmp.lt.s32.totalorder %s148_s1, %s148_s1 }
  0x12   :  { %163 = vmatmul.mubr.msk.f32.vlgmr.msra.gmra.mxu0 %vm35_vm1, %v28_v4  ;;  %v121_v14 = vsub.s32 0, %v120_v9  ;;  %p196_p5 = scmp.ne.s32.totalorder %s148_s1, %s195_s2  ;;  %p201_p7 = scmp.lt.s32.totalorder %s195_s2, %s195_s2 }
  0x14   :  { %p202_p8 = por %p201_p7, %p200_p6 }
  0x16   :  { %p203_p9 = pnand %p202_p8, %p196_p5 }
  0x8b   :  { %v33_v6 = vpop.permute.xlu0 %32 }
  0xd2   :  { %v108_v7 = vpop.f32.mrf.mxu0 }
  0xd3   :  { %v109_v8 = vadd.f32 %v108_v7, %v33_v6 }
  0xd4   :  { %v164_v10 = vpop.f32.mrf.mxu0 }
  0xd5   :  { %v113_v11 = vrot.slane %v109_v8, 1  ;;  %v116_v13 = vrot.slane %v109_v8, 2 }
  0xd7   :  { %v115_v12 = vmax.f32 %v109_v8, %v113_v11 }
  0xd9   :  { %v118_v15 = vmax.f32 %v115_v12, %v116_v13 }
  0xdb   :  { %v122_v16 = vrot.slane %v118_v15, %v121_v14 }
  0xdd   :  { %v123_v17 = vsub.f32 %v109_v8, %v122_v16 }
  0xdf   :  { %v124_v18 = vmul.f32 1.442695, %v123_v17 }
  0xe1   :  { %171 = vpow2.f32 %v124_v18 }
  0xee   :  { %v172_v19 = vpop.eup %171 }
  0xef   :  { %v127_v20 = vrot.slane %v172_v19, 1  ;;  %v130_v22 = vrot.slane %v172_v19, 2 }
  0xf1   :  { %v129_v21 = vadd.f32 %v172_v19, %v127_v20 }
  0xf3   :  { %v132_v23 = vadd.f32 %v130_v22, %v129_v21 }
  0xf5   :  { %v136_v24 = vrot.slane %v132_v23, %v121_v14 }
  0xf7   :  { %173 = vrcp.f32 %v136_v24 }
 0x104   :  { %v174_v25 = vpop.eup %173 }
 0x105   :  { %v138_v26 = vmul.f32 %v174_v25, %v172_v19 }
 0x107   :  { %140 = vst.msk [vmem:[#allocation5] sm:$0x7] %vm139_vm2, %v138_v26 }
 0x108   :  { %206 = shalt.err (!%p203_p9)
}
 0x109   :  { %150 = dma.vmem_to_hbm [thread:$0]  %s148_s1, 64, %s259_s3, [#allocation4]  }
 0x10a   :  { %217 = dma.done.wait [#allocation4], 64  }
 0x10b   :  { %218 = vsyncadd [#allocation4], 4294967232 }
 0x10c   :  { %154 = vsyncpa [#allocation3], 1 }
 0x10d   :  { %155 = vsyncpa [#allocation4], 1 }

</bundles_post_ra>
